<compile_context>
chip_gen: v6e
topology: v6e:2x2x1
jax: 0.10.0
libtpu: 0.0.40
codegen_flags: <defaults>
</compile_context>

<pallas_src>
import jax
import jax.numpy as jnp
import numpy as np
from jax import lax
from jax.experimental import pallas as pl
from jax.experimental.pallas import tpu as pltpu

# ----------------------------- problem sizes -----------------------------
ACTION_NUM = 8            # new_index has 9 entries -> action_num + 1 == 9
N_STATES = 10
N_DEST = 10
PATH_FEAT = 7
LINK_FEAT = 4
INPUT_DIM = PATH_FEAT + LINK_FEAT + 1   # = 12  (conv1 in-channels)
K1 = INPUT_DIM * 9                      # = 108 flattened conv1 input features
PADN = 128                              # lane-aligned block width
GRP = 32                                # lane offset between pool-window groups
C1 = 20                                 # conv1 out channels
C2 = 30                                 # conv2 out channels
OH_IN = 112                             # one-hot lanes in the packed input
OH_Q = 20                               # one-hot lanes in PP (pooled block)
OH_H2 = 40                              # one-hot lanes in h2 (post-conv2)
NEW_INDEX = np.array([7, 0, 1, 6, 8, 2, 5, 4, 3], dtype=np.int32)

# 2x2 stride-1 max-pool windows over the 3x3 conv1 grid (row-major positions);
# window index g == kh*2 + kw of the pooled map / conv2 kernel position.
POOL_WINDOWS = ((0, 1, 3, 4), (1, 2, 4, 5), (3, 4, 6, 7), (4, 5, 7, 8))


def _leaky_relu(x, slope=0.2):
    # max(x, slope*x) == leaky_relu for 0 < slope < 1 (2 VALU ops).
    return jnp.maximum(x, slope * x)


# ------------------------------ Pallas kernel -----------------------------
def disc_kernel(x_ref, w1_ref, b1_ref, w2_ref, b2_ref,
                fw1_ref, fb1_ref, fw2_ref, fb2_ref, fw3_ref, fb3_ref,
                out_ref):
    # conv1 for all 4 pool-window member sets in one bf16 matmul (f32 acc).
    q = jnp.dot(x_ref[...], w1_ref[...],
                preferred_element_type=jnp.float32)            # (TB, 4*128)

    # MaxPool2d(2, stride=1): element-wise max of the 4 member blocks.
    # Padded lanes stay exactly 0; the one-hot (values >= 0) at lanes 20..27
    # of block 0 rides through untouched (other blocks are 0 there).
    pp = jnp.maximum(jnp.maximum(q[:, :PADN], q[:, PADN:2 * PADN]),
                     jnp.maximum(q[:, 2 * PADN:3 * PADN], q[:, 3 * PADN:]))

    # Bias + leaky deferred past the pool (exact: bias identical across
    # window members, leaky monotone, leaky(0)=0, leaky({0,1})={0,1}).
    pp = _leaky_relu(pp + b1_ref[...])                          # (TB, 128)

    # conv2 (2x2 valid) + one-hot pass-through, one bf16 matmul.
    h2 = _leaky_relu(jnp.dot(pp.astype(jnp.bfloat16), w2_ref[...],
                             preferred_element_type=jnp.float32)
                     + b2_ref[...])                             # (TB, 128)

    # fc1 (concat with one-hot already realized via pass-through lanes).
    z1 = _leaky_relu(jnp.dot(h2.astype(jnp.bfloat16), fw1_ref[...],
                             preferred_element_type=jnp.float32)
                     + fb1_ref[...])                            # (TB, 128)
    z2 = _leaky_relu(jnp.dot(z1.astype(jnp.bfloat16), fw2_ref[...],
                             preferred_element_type=jnp.float32)
                     + fb2_ref[...])                            # (TB, 128)
    z3 = jnp.dot(z2.astype(jnp.bfloat16), fw3_ref[...],
                 preferred_element_type=jnp.float32) + fb3_ref[...]

    # sigmoid via EUP exp + approx reciprocal; 128-lane-dense store.
    out_ref[...] = pl.reciprocal(1.0 + jnp.exp(-z3), approx=True)


def _choose_block(B, block_b):
    """Batch tile: multiple of 8, capped at block_b, >=2 grid steps if B>8."""
    if B <= 8:
        return B                       # single tile; equals full dim -> legal
    half = (B + 1) // 2
    tb = ((half + 7) // 8) * 8
    return max(8, min(block_b, tb))


def discriminator_pallas(x_flat, onehot, params, *, block_b=512):
    """x_flat: (B, 108) f32; onehot: (B, 8) f32 -> (B, 128) f32 (col 0 = prob)."""
    B = x_flat.shape[0]

    # Lane-dense packed input: im2col features at lanes 0..107, one-hot at
    # lanes 112..119, rest zero; bf16 so the MXU gets a clean 128-deep K tile.
    x128 = jnp.zeros((B, PADN), jnp.float32)
    x128 = x128.at[:, :K1].set(x_flat)
    x128 = x128.at[:, OH_IN:OH_IN + ACTION_NUM].set(onehot)
    x128 = x128.astype(jnp.bfloat16)

    TB = _choose_block(B, block_b)
    grid = (pl.cdiv(B, TB),)

    weights = (params["w1"], params["b1"], params["w2"], params["b2"],
               params["fw1"], params["fb1"], params["fw2"], params["fb2"],
               params["fw3"], params["fb3"])

    def _const_spec(a):
        nd = a.ndim
        return pl.BlockSpec(a.shape, lambda i, _nd=nd: (0,) * _nd)

    in_specs = ([pl.BlockSpec((TB, PADN), lambda i: (i, 0))]
                + [_const_spec(w) for w in weights])
    out_spec = pl.BlockSpec((TB, PADN), lambda i: (i, 0))

    return pl.pallas_call(
        disc_kernel,
        grid=grid,
        in_specs=in_specs,
        out_specs=out_spec,
        out_shape=jax.ShapeDtypeStruct((B, PADN), jnp.float32),
        compiler_params=pltpu.CompilerParams(
            dimension_semantics=("parallel",)),
    )(x128, *weights)


# ------------------------------ JAX glue ----------------------------------
def process_features(state, des, tables):
    """Replicates DiscriminatorCNN.process_features; returns (B, C, 3, 3)."""
    # TODO(synk): the table gathers / one-hot remain outside the Pallas kernel.
    A1 = ACTION_NUM + 1
    state_neighbor = tables["action_state_pad"][state]               # (B, A+1)
    des_rep = jnp.repeat(des[:, None], A1, axis=1)                   # (B, A+1)
    neigh_path = tables["path_feature"][state_neighbor, des_rep]     # (B, A+1, pf)
    neigh_edge = tables["link_feature"][state_neighbor]              # (B, A+1, lf)
    neigh_mask = tables["policy_mask_pad"][state][..., None].astype(jnp.float32)
    neigh = jnp.concatenate([neigh_path, neigh_edge, neigh_mask], -1)
    neigh = neigh[:, jnp.asarray(NEW_INDEX), :]                      # (B, 9, C)
    x = neigh.reshape(state.shape[0], 3, 3, -1)
    return jnp.transpose(x, (0, 3, 1, 2))                            # NCHW


def pack_params(raw):
    """Pre-pack PyTorch-layout params into fused / padded bf16 layouts."""
    w1 = np.asarray(raw["conv1_w"], np.float32)      # (20, C, 3, 3)
    b1 = np.asarray(raw["conv1_b"], np.float32)      # (20,)
    w2 = np.asarray(raw["conv2_w"], np.float32)      # (30, 20, 2, 2)
    b2 = np.asarray(raw["conv2_b"], np.float32)      # (30,)
    fc1_w = np.asarray(raw["fc1_w"], np.float32)     # (120, 38)
    fc1_b = np.asarray(raw["fc1_b"], np.float32)
    fc2_w = np.asarray(raw["fc2_w"], np.float32)     # (84, 120)
    fc2_b = np.asarray(raw["fc2_b"], np.float32)
    fc3_w = np.asarray(raw["fc3_w"], np.float32)     # (1, 84)
    fc3_b = np.asarray(raw["fc3_b"], np.float32)

    # conv1 -> (128, 4*128): N block k carries the k-th member of every pool
    # window; window g lives at lane offset GRP*g, channels 0..19.
    w1_big = np.zeros((PADN, 4 * PADN), np.float32)
    for g, window in enumerate(POOL_WINDOWS):
        for k, p in enumerate(window):
            oi, oj = divmod(p, 3)
            for kh in range(3):
                for kw in range(3):
                    ih, iw = oi + kh - 1, oj + kw - 1
                    if 0 <= ih < 3 and 0 <= iw < 3:
                        rows = np.arange(INPUT_DIM) * 9 + ih * 3 + iw
                        cols = k * PADN + GRP * g + np.arange(C1)
                        w1_big[np.ix_(rows, cols)] = w1[:, :, kh, kw].T
    # One-hot pass-through: input lanes OH_IN.. -> block 0 lanes OH_Q..
    for a in range(ACTION_NUM):
        w1_big[OH_IN + a, OH_Q + a] = 1.0

    b1_pool = np.zeros((1, PADN), np.float32)
    for g in range(4):
        b1_pool[0, GRP * g: GRP * g + C1] = b1

    # conv2 (2x2 valid) as one (128,128) matmul + one-hot pass-through.
    w2_big = np.zeros((PADN, PADN), np.float32)
    for kh in range(2):
        for kw in range(2):
            g = kh * 2 + kw
            w2_big[GRP * g: GRP * g + C1, :C2] = w2[:, :, kh, kw].T
    for a in range(ACTION_NUM):
        w2_big[OH_Q + a, OH_H2 + a] = 1.0
    b2p = np.zeros((1, PADN), np.float32)
    b2p[0, :C2] = b2

    # fc1: rows 0..29 <- h2 channels, rows 40..47 <- one-hot pass-through.
    fw1 = np.zeros((PADN, PADN), np.float32)
    fw1[:C2, :120] = fc1_w[:, :C2].T
    fw1[OH_H2:OH_H2 + ACTION_NUM, :120] = fc1_w[:, C2:C2 + ACTION_NUM].T
    fb1 = np.zeros((1, PADN), np.float32)
    fb1[0, :120] = fc1_b

    fw2 = np.zeros((PADN, PADN), np.float32)
    fw2[:120, :84] = fc2_w.T
    fb2 = np.zeros((1, PADN), np.float32)
    fb2[0, :84] = fc2_b

    fw3 = np.zeros((PADN, PADN), np.float32)
    fw3[:84, 0] = fc3_w[0]
    fb3 = np.zeros((1, PADN), np.float32)
    fb3[0, 0] = fc3_b[0]

    bf = jnp.bfloat16
    return {
        "w1": jnp.asarray(w1_big, bf), "b1": jnp.asarray(b1_pool),
        "w2": jnp.asarray(w2_big, bf), "b2": jnp.asarray(b2p),
        "fw1": jnp.asarray(fw1, bf), "fb1": jnp.asarray(fb1),
        "fw2": jnp.asarray(fw2, bf), "fb2": jnp.asarray(fb2),
        "fw3": jnp.asarray(fw3, bf), "fb3": jnp.asarray(fb3),
    }


def init_params(key):
    ks = jax.random.split(key, 10)
    s = 0.1
    raw = {
        "conv1_w": s * jax.random.normal(ks[0], (C1, INPUT_DIM, 3, 3), jnp.float32),
        "conv1_b": s * jax.random.normal(ks[1], (C1,), jnp.float32),
        "conv2_w": s * jax.random.normal(ks[2], (C2, C1, 2, 2), jnp.float32),
        "conv2_b": s * jax.random.normal(ks[3], (C2,), jnp.float32),
        "fc1_w": s * jax.random.normal(ks[4], (120, C2 + ACTION_NUM), jnp.float32),
        "fc1_b": s * jax.random.normal(ks[5], (120,), jnp.float32),
        "fc2_w": s * jax.random.normal(ks[6], (84, 120), jnp.float32),
        "fc2_b": s * jax.random.normal(ks[7], (84,), jnp.float32),
        "fc3_w": s * jax.random.normal(ks[8], (1, 84), jnp.float32),
        "fc3_b": s * jax.random.normal(ks[9], (1,), jnp.float32),
    }
    return raw, pack_params(raw)


def reference_forward(x_nchw, onehot, raw):
    """Pure-JAX/XLA f32 reference with the original PyTorch-layout params."""
    dn = ("NCHW", "OIHW", "NCHW")
    y = lax.conv_general_dilated(x_nchw, raw["conv1_w"], (1, 1),
                                 ((1, 1), (1, 1)), dimension_numbers=dn)
    y = _leaky_relu(y + raw["conv1_b"][None, :, None, None])
    # MaxPool2d(2, stride=1)
    y = jnp.maximum(jnp.maximum(y[:, :, :-1, :-1], y[:, :, :-1, 1:]),
                    jnp.maximum(y[:, :, 1:, :-1], y[:, :, 1:, 1:]))
    y = lax.conv_general_dilated(y, raw["conv2_w"], (1, 1), "VALID",
                                 dimension_numbers=dn)
    y = _leaky_relu(y + raw["conv2_b"][None, :, None, None])   # (B, 30, 1, 1)
    y = y.reshape(-1, C2)
    feat = jnp.concatenate([y, onehot], axis=1)
    z1 = _leaky_relu(feat @ raw["fc1_w"].T + raw["fc1_b"])
    z2 = _leaky_relu(z1 @ raw["fc2_w"].T + raw["fc2_b"])
    return jax.nn.sigmoid(z2 @ raw["fc3_w"].T + raw["fc3_b"])


if __name__ == "__main__":
    key = jax.random.PRNGKey(0)
    k_tab, k_par, k_in = jax.random.split(key, 3)
    kt = jax.random.split(k_tab, 4)

    # Synthetic lookup tables (deterministic).
    action_state = jax.random.randint(kt[0], (N_STATES, ACTION_NUM), 0, N_STATES, jnp.int32)
    policy_mask = jax.random.randint(kt[1], (N_STATES, ACTION_NUM), 0, 2, jnp.int32)
    path_feature = jax.random.normal(kt[2], (N_STATES, N_DEST, PATH_FEAT), jnp.float32)
    link_feature = jax.random.normal(kt[3], (N_STATES, LINK_FEAT), jnp.float32)
    tables = {
        "action_state_pad": jnp.concatenate(
            [action_state, jnp.arange(N_STATES, dtype=jnp.int32)[:, None]], axis=1),
        "policy_mask_pad": jnp.concatenate(
            [policy_mask, jnp.zeros((N_STATES, 1), jnp.int32)], axis=1),
        "path_feature": path_feature,
        "link_feature": link_feature,
    }

    raw, params = init_params(k_par)

    # Small example batch (16 -> two grid steps, exercises the batch tiling).
    B = 16
    ki = jax.random.split(k_in, 3)
    state = jax.random.randint(ki[0], (B,), 0, N_STATES, jnp.int32)
    des = jax.random.randint(ki[1], (B,), 0, N_DEST, jnp.int32)
    act = jax.random.randint(ki[2], (B,), 0, ACTION_NUM, jnp.int32)

    # Glue: feature gather + flatten + one-hot (plain JAX; data-dependent gathers).
    x = process_features(state, des, tables)             # (B, C, 3, 3)
    x_flat = x.reshape(B, K1)                             # (B, 108), order (c, h, w)
    onehot = jax.nn.one_hot(act, ACTION_NUM, dtype=jnp.float32)

    # Hot path in Pallas; lane-dense (B, 128) output, prob lives in column 0.
    prob_full = jax.block_until_ready(discriminator_pallas(x_flat, onehot, params))
    prob = prob_full[:, :1]

    ref = jax.block_until_ready(reference_forward(x, onehot, raw))
    assert prob.shape == (B, 1)
    # Tolerance covers bf16 matmul inputs (f32 accumulation) + approx reciprocal.
    np.testing.assert_allclose(np.asarray(prob), np.asarray(ref), rtol=1e-2, atol=1e-2)
    print("KERNEL_OK")
</pallas_src>

<mosaic_0001>
module attributes {stable_mosaic.version = 11 : i64} {
  func.func @disc_kernel(%arg0: i32, %arg1: memref<8x128xbf16, #tpu.memory_space<vmem>>, %arg2: memref<128x512xbf16, #tpu.memory_space<vmem>>, %arg3: memref<1x128xf32, #tpu.memory_space<vmem>>, %arg4: memref<128x128xbf16, #tpu.memory_space<vmem>>, %arg5: memref<1x128xf32, #tpu.memory_space<vmem>>, %arg6: memref<128x128xbf16, #tpu.memory_space<vmem>>, %arg7: memref<1x128xf32, #tpu.memory_space<vmem>>, %arg8: memref<128x128xbf16, #tpu.memory_space<vmem>>, %arg9: memref<1x128xf32, #tpu.memory_space<vmem>>, %arg10: memref<128x128xbf16, #tpu.memory_space<vmem>>, %arg11: memref<1x128xf32, #tpu.memory_space<vmem>>, %arg12: memref<8x128xf32, #tpu.memory_space<vmem>>) attributes {dimension_semantics = [#tpu.dimension_semantics<parallel>], iteration_bounds = array<i64: 2>, scalar_prefetch = 0 : i64, scratch_operands = 0 : i64, tpu.core_type = #tpu.core_type<tc>, window_params = [{transform_indices = @transform_0, window_bounds = array<i64: 8, 128>}, {pipeline_mode = #tpu.pipeline_mode<synchronous>, transform_indices = @transform_1, window_bounds = array<i64: 128, 512>}, {pipeline_mode = #tpu.pipeline_mode<synchronous>, transform_indices = @transform_2, window_bounds = array<i64: 1, 128>}, {pipeline_mode = #tpu.pipeline_mode<synchronous>, transform_indices = @transform_3, window_bounds = array<i64: 128, 128>}, {pipeline_mode = #tpu.pipeline_mode<synchronous>, transform_indices = @transform_4, window_bounds = array<i64: 1, 128>}, {pipeline_mode = #tpu.pipeline_mode<synchronous>, transform_indices = @transform_5, window_bounds = array<i64: 128, 128>}, {pipeline_mode = #tpu.pipeline_mode<synchronous>, transform_indices = @transform_6, window_bounds = array<i64: 1, 128>}, {pipeline_mode = #tpu.pipeline_mode<synchronous>, transform_indices = @transform_7, window_bounds = array<i64: 128, 128>}, {pipeline_mode = #tpu.pipeline_mode<synchronous>, transform_indices = @transform_8, window_bounds = array<i64: 1, 128>}, {pipeline_mode = #tpu.pipeline_mode<synchronous>, transform_indices = @transform_9, window_bounds = array<i64: 128, 128>}, {pipeline_mode = #tpu.pipeline_mode<synchronous>, transform_indices = @transform_10, window_bounds = array<i64: 1, 128>}, {transform_indices = @transform_11, window_bounds = array<i64: 8, 128>}]} {
    %c0 = arith.constant 0 : index
    %c0_0 = arith.constant 0 : index
    %0 = vector.load %arg1[%c0, %c0_0] : memref<8x128xbf16, #tpu.memory_space<vmem>>, vector<8x128xbf16>
    %c0_1 = arith.constant 0 : index
    %c0_2 = arith.constant 0 : index
    %1 = vector.load %arg2[%c0_1, %c0_2] : memref<128x512xbf16, #tpu.memory_space<vmem>>, vector<128x512xbf16>
    %cst = arith.constant dense<0.000000e+00> : vector<8x512xf32>
    %2 = tpu.matmul %0, %1, %cst {dimension_numbers = #tpu.dot_dimension_numbers<[1], [0], [0], [1], [0, 0, 1, 1], [], []>} : vector<8x128xbf16>, vector<128x512xbf16>, vector<8x512xf32> -> vector<8x512xf32>
    %3 = vector.extract_strided_slice %2 {offsets = [0, 0], sizes = [8, 128], strides = [1, 1]} : vector<8x512xf32> to vector<8x128xf32>
    %4 = vector.extract_strided_slice %2 {offsets = [0, 128], sizes = [8, 128], strides = [1, 1]} : vector<8x512xf32> to vector<8x128xf32>
    %5 = arith.maximumf %3, %4 : vector<8x128xf32>
    %6 = vector.extract_strided_slice %2 {offsets = [0, 256], sizes = [8, 128], strides = [1, 1]} : vector<8x512xf32> to vector<8x128xf32>
    %7 = vector.extract_strided_slice %2 {offsets = [0, 384], sizes = [8, 128], strides = [1, 1]} : vector<8x512xf32> to vector<8x128xf32>
    %8 = arith.maximumf %6, %7 : vector<8x128xf32>
    %9 = arith.maximumf %5, %8 : vector<8x128xf32>
    %c0_3 = arith.constant 0 : index
    %c0_4 = arith.constant 0 : index
    %10 = vector.load %arg3[%c0_3, %c0_4] : memref<1x128xf32, #tpu.memory_space<vmem>>, vector<1x128xf32>
    %11 = vector.broadcast %10 : vector<1x128xf32> to vector<8x128xf32>
    %12 = arith.addf %9, %11 : vector<8x128xf32>
    %cst_5 = arith.constant 2.000000e-01 : f32
    %13 = vector.broadcast %cst_5 : f32 to vector<8x128xf32>
    %14 = arith.mulf %13, %12 : vector<8x128xf32>
    %15 = arith.maximumf %12, %14 : vector<8x128xf32>
    %16 = arith.truncf %15 : vector<8x128xf32> to vector<8x128xbf16>
    %c0_6 = arith.constant 0 : index
    %c0_7 = arith.constant 0 : index
    %17 = vector.load %arg4[%c0_6, %c0_7] : memref<128x128xbf16, #tpu.memory_space<vmem>>, vector<128x128xbf16>
    %cst_8 = arith.constant dense<0.000000e+00> : vector<8x128xf32>
    %18 = tpu.matmul %16, %17, %cst_8 {dimension_numbers = #tpu.dot_dimension_numbers<[1], [0], [0], [1], [0, 0, 1, 1], [], []>} : vector<8x128xbf16>, vector<128x128xbf16>, vector<8x128xf32> -> vector<8x128xf32>
    %c0_9 = arith.constant 0 : index
    %c0_10 = arith.constant 0 : index
    %19 = vector.load %arg5[%c0_9, %c0_10] : memref<1x128xf32, #tpu.memory_space<vmem>>, vector<1x128xf32>
    %20 = vector.broadcast %19 : vector<1x128xf32> to vector<8x128xf32>
    %21 = arith.addf %18, %20 : vector<8x128xf32>
    %cst_11 = arith.constant 2.000000e-01 : f32
    %22 = vector.broadcast %cst_11 : f32 to vector<8x128xf32>
    %23 = arith.mulf %22, %21 : vector<8x128xf32>
    %24 = arith.maximumf %21, %23 : vector<8x128xf32>
    %25 = arith.truncf %24 : vector<8x128xf32> to vector<8x128xbf16>
    %c0_12 = arith.constant 0 : index
    %c0_13 = arith.constant 0 : index
    %26 = vector.load %arg6[%c0_12, %c0_13] : memref<128x128xbf16, #tpu.memory_space<vmem>>, vector<128x128xbf16>
    %cst_14 = arith.constant dense<0.000000e+00> : vector<8x128xf32>
    %27 = tpu.matmul %25, %26, %cst_14 {dimension_numbers = #tpu.dot_dimension_numbers<[1], [0], [0], [1], [0, 0, 1, 1], [], []>} : vector<8x128xbf16>, vector<128x128xbf16>, vector<8x128xf32> -> vector<8x128xf32>
    %c0_15 = arith.constant 0 : index
    %c0_16 = arith.constant 0 : index
    %28 = vector.load %arg7[%c0_15, %c0_16] : memref<1x128xf32, #tpu.memory_space<vmem>>, vector<1x128xf32>
    %29 = vector.broadcast %28 : vector<1x128xf32> to vector<8x128xf32>
    %30 = arith.addf %27, %29 : vector<8x128xf32>
    %cst_17 = arith.constant 2.000000e-01 : f32
    %31 = vector.broadcast %cst_17 : f32 to vector<8x128xf32>
    %32 = arith.mulf %31, %30 : vector<8x128xf32>
    %33 = arith.maximumf %30, %32 : vector<8x128xf32>
    %34 = arith.truncf %33 : vector<8x128xf32> to vector<8x128xbf16>
    %c0_18 = arith.constant 0 : index
    %c0_19 = arith.constant 0 : index
    %35 = vector.load %arg8[%c0_18, %c0_19] : memref<128x128xbf16, #tpu.memory_space<vmem>>, vector<128x128xbf16>
    %cst_20 = arith.constant dense<0.000000e+00> : vector<8x128xf32>
    %36 = tpu.matmul %34, %35, %cst_20 {dimension_numbers = #tpu.dot_dimension_numbers<[1], [0], [0], [1], [0, 0, 1, 1], [], []>} : vector<8x128xbf16>, vector<128x128xbf16>, vector<8x128xf32> -> vector<8x128xf32>
    %c0_21 = arith.constant 0 : index
    %c0_22 = arith.constant 0 : index
    %37 = vector.load %arg9[%c0_21, %c0_22] : memref<1x128xf32, #tpu.memory_space<vmem>>, vector<1x128xf32>
    %38 = vector.broadcast %37 : vector<1x128xf32> to vector<8x128xf32>
    %39 = arith.addf %36, %38 : vector<8x128xf32>
    %cst_23 = arith.constant 2.000000e-01 : f32
    %40 = vector.broadcast %cst_23 : f32 to vector<8x128xf32>
    %41 = arith.mulf %40, %39 : vector<8x128xf32>
    %42 = arith.maximumf %39, %41 : vector<8x128xf32>
    %43 = arith.truncf %42 : vector<8x128xf32> to vector<8x128xbf16>
    %c0_24 = arith.constant 0 : index
    %c0_25 = arith.constant 0 : index
    %44 = vector.load %arg10[%c0_24, %c0_25] : memref<128x128xbf16, #tpu.memory_space<vmem>>, vector<128x128xbf16>
    %cst_26 = arith.constant dense<0.000000e+00> : vector<8x128xf32>
    %45 = tpu.matmul %43, %44, %cst_26 {dimension_numbers = #tpu.dot_dimension_numbers<[1], [0], [0], [1], [0, 0, 1, 1], [], []>} : vector<8x128xbf16>, vector<128x128xbf16>, vector<8x128xf32> -> vector<8x128xf32>
    %c0_27 = arith.constant 0 : index
    %c0_28 = arith.constant 0 : index
    %46 = vector.load %arg11[%c0_27, %c0_28] : memref<1x128xf32, #tpu.memory_space<vmem>>, vector<1x128xf32>
    %47 = vector.broadcast %46 : vector<1x128xf32> to vector<8x128xf32>
    %48 = arith.addf %45, %47 : vector<8x128xf32>
    %cst_29 = arith.constant 0.000000e+00 : f32
    %49 = vector.broadcast %cst_29 : f32 to vector<8x128xf32>
    %50 = arith.subf %49, %48 : vector<8x128xf32>
    %51 = math.exp %50 : vector<8x128xf32>
    %cst_30 = arith.constant 1.000000e+00 : f32
    %52 = vector.broadcast %cst_30 : f32 to vector<8x128xf32>
    %53 = arith.addf %52, %51 : vector<8x128xf32>
    %54 = tpu.reciprocal %53 {approx = true} : vector<8x128xf32> -> vector<8x128xf32>
    %c0_31 = arith.constant 0 : index
    %c0_32 = arith.constant 0 : index
    %55 = vector.load %arg12[%c0_31, %c0_32] : memref<8x128xf32, #tpu.memory_space<vmem>>, vector<8x128xf32>
    tpu.vector_store %arg12[%c0_31, %c0_32], %54 {strides = array<i32>} : memref<8x128xf32, #tpu.memory_space<vmem>>, vector<8x128xf32>,
    return
  }
  func.func @transform_0(%arg0: i32) -> (i32, i32) {
    %c0_i32 = arith.constant 0 : i32
    %c0_i32_0 = arith.constant 0 : i32
    return %arg0, %c0_i32 : i32, i32
  }
  func.func @transform_1(%arg0: i32) -> (i32, i32) {
    %c0_i32 = arith.constant 0 : i32
    %c0_i32_0 = arith.constant 0 : i32
    %c0_i32_1 = arith.constant 0 : i32
    return %c0_i32, %c0_i32_0 : i32, i32
  }
  func.func @transform_2(%arg0: i32) -> (i32, i32) {
    %c0_i32 = arith.constant 0 : i32
    %c0_i32_0 = arith.constant 0 : i32
    %c0_i32_1 = arith.constant 0 : i32
    return %c0_i32, %c0_i32_0 : i32, i32
  }
  func.func @transform_3(%arg0: i32) -> (i32, i32) {
    %c0_i32 = arith.constant 0 : i32
    %c0_i32_0 = arith.constant 0 : i32
    %c0_i32_1 = arith.constant 0 : i32
    return %c0_i32, %c0_i32_0 : i32, i32
  }
  func.func @transform_4(%arg0: i32) -> (i32, i32) {
    %c0_i32 = arith.constant 0 : i32
    %c0_i32_0 = arith.constant 0 : i32
    %c0_i32_1 = arith.constant 0 : i32
    return %c0_i32, %c0_i32_0 : i32, i32
  }
  func.func @transform_5(%arg0: i32) -> (i32, i32) {
    %c0_i32 = arith.constant 0 : i32
    %c0_i32_0 = arith.constant 0 : i32
    %c0_i32_1 = arith.constant 0 : i32
    return %c0_i32, %c0_i32_0 : i32, i32
  }
  func.func @transform_6(%arg0: i32) -> (i32, i32) {
    %c0_i32 = arith.constant 0 : i32
    %c0_i32_0 = arith.constant 0 : i32
    %c0_i32_1 = arith.constant 0 : i32
    return %c0_i32, %c0_i32_0 : i32, i32
  }
  func.func @transform_7(%arg0: i32) -> (i32, i32) {
    %c0_i32 = arith.constant 0 : i32
    %c0_i32_0 = arith.constant 0 : i32
    %c0_i32_1 = arith.constant 0 : i32
    return %c0_i32, %c0_i32_0 : i32, i32
  }
  func.func @transform_8(%arg0: i32) -> (i32, i32) {
    %c0_i32 = arith.constant 0 : i32
    %c0_i32_0 = arith.constant 0 : i32
    %c0_i32_1 = arith.constant 0 : i32
    return %c0_i32, %c0_i32_0 : i32, i32
  }
  func.func @transform_9(%arg0: i32) -> (i32, i32) {
    %c0_i32 = arith.constant 0 : i32
    %c0_i32_0 = arith.constant 0 : i32
    %c0_i32_1 = arith.constant 0 : i32
    return %c0_i32, %c0_i32_0 : i32, i32
  }
  func.func @transform_10(%arg0: i32) -> (i32, i32) {
    %c0_i32 = arith.constant 0 : i32
    %c0_i32_0 = arith.constant 0 : i32
    %c0_i32_1 = arith.constant 0 : i32
    return %c0_i32, %c0_i32_0 : i32, i32
  }
  func.func @transform_11(%arg0: i32) -> (i32, i32) {
    %c0_i32 = arith.constant 0 : i32
    %c0_i32_0 = arith.constant 0 : i32
    return %arg0, %c0_i32 : i32, i32
  }
}

</mosaic_0001>

<bundles_post_ra>
// kernel: tpu_custom_call.1
= control target key start
LH: loop header
LB: loop body
LE: loop exit
PB: predicated region body
PF: predicated region fallthrough
CT: control target
= control target key end

     0   :  { %s2342_s0 = inlined_call_operand.hbm [shape: bf16[16,128], index: 0, kind: input, shape index: {}]   ;;  %s2343_s1 = inlined_call_operand.hbm [shape: bf16[128,512], index: 1, kind: input, shape index: {}]   ;;  %s2344_s2 = inlined_call_operand.vmem [shape: f32[1,128], index: 2, kind: input, shape index: {}]   ;;  %s2345_s3 = inlined_call_operand.hbm [shape: bf16[128,128], index: 3, kind: input, shape index: {}]   ;;  %s2346_s4 = inlined_call_operand.vmem [shape: f32[1,128], index: 4, kind: input, shape index: {}]   ;;  %s2347_s5 = inlined_call_operand.hbm [shape: bf16[128,128], index: 5, kind: input, shape index: {}]   ;;  %s2348_s6 = inlined_call_operand.vmem [shape: f32[1,128], index: 6, kind: input, shape index: {}]   ;;  %s2349_s7 = inlined_call_operand.hbm [shape: bf16[128,128], index: 7, kind: input, shape index: {}]   ;;  %s2350_s8 = inlined_call_operand.vmem [shape: f32[1,128], index: 8, kind: input, shape index: {}]   ;;  %s2351_s9 = inlined_call_operand.hbm [shape: bf16[128,128], index: 9, kind: input, shape index: {}]   ;;  %s2352_s10 = inlined_call_operand.vmem [shape: f32[1,128], index: 10, kind: input, shape index: {}]   ;;  %s2353_s11 = inlined_call_operand.hbm [shape: f32[16,128], index: 11, kind: output, shape index: {}]  }
   0x1   :  { %2358 = sst [smem:[#allocation20_spill]] %s2343_s1 }
   0x2   :  { %2359 = sst [smem:[#allocation21_spill]] %s2345_s3 }
   0x3   :  { %2360 = sst [smem:[#allocation22_spill]] %s2347_s5 }
   0x4   :  { %2361 = sst [smem:[#allocation23_spill]] %s2349_s7 }
   0x5   :  { %2362 = sst [smem:[#allocation24_spill]] %s2351_s9 }
   0x6   :  { %16 = vsyncpa [#allocation3], 0 }
   0x7   :  { %18 = vsyncpa [#allocation3 + $0x1], 0 }
   0x8   :  { %19 = vsyncpa [#allocation6], 0 }
   0x9   :  { %20 = vsyncpa [#allocation9], 0 }
   0xa   :  { %21 = vsyncpa [#allocation12], 0 }
   0xb   :  { %22 = vsyncpa [#allocation4], 0 }
   0xc   :  { %24 = vsyncpa [#allocation4 + $0x1], 0  ;;  %s2061_s17 = smov 0   ;;  %s2063_s18 = smov 0  }
   0xd   :  { %s2065_s19 = smov 0   ;;  %s2067_s20 = smov 0  }
   0xe LB: > { %s1987_s21 = smov [#allocation5]   ;;  %s2082_s23 = sadd.s32 4294967295, %s1985_s20   ;;  %s1985_s20 = sphi %s2067_s20, %s2391_s20   ;;  %s1981_s19 = sphi %s2065_s19, %s2390_s19   ;;  %s1977_s18 = sphi %s2063_s18, %s2389_s18   ;;  %s1973_s17 = sphi %s2061_s17, %s2388_s17  }
   0xf   : > { %s309_s22 = sshll.u32 %s1987_s21, 4  ;;  %p1357_p0 = scmp.ge.s32.totalorder %s1985_s20, 1  ;;  %s310_s22 = int_to_ptr.vmem [resolvable:$true] %s309_s22 }
  0x10   : > { %p2354_p1 = scmp.eq.s32.totalorder %s2082_s23, 0  ;;  %p297_p2 = scmp.lt.s32.totalorder %s1985_s20, 3 }
  0x11   : > { %s1988_s26 = smov [#allocation8]   ;;  %s1989_s28 = smov [#allocation7]  }
  0x12   : > { %p2087_p3 = pnand %p1357_p0, %p297_p2  ;;  %s341_s27 = sshll.u32 %s1988_s26, 4  ;;  %s2100_s27 = int_to_ptr.vmem [resolvable:$true] %s341_s27 }
  0x13   : > { %s2102_s29 = sshll.u32 %s1989_s28, 4  ;;  %s1762_s12 = scalar_lea.vmem %s310_s22, 4096  ;;  %s326_s29 = int_to_ptr.vmem [resolvable:$true] %s2102_s29 }
  0x14   : > { %s2363_s24 = scalar_select %p2087_p3, 1, 0 }
  0x15   : > { %p1587_p5 = pneg %p2087_p3  ;;  %p1763_p8 = scmp.ne.s32.totalorder %s310_s22, %s1762_s12 }
  0x16   : > { %p1770_p11 = scmp.lt.s32.totalorder %s310_s22, %s310_s22  ;;  %p1771_p12 = scmp.lt.s32.totalorder %s1762_s12, %s1762_s12 }
  0x17   : > { %p2096_p6 = pnand %p1587_p5, %p2354_p1 }
  0x18   : > { %p1772_p13 = por %p1771_p12, %p1770_p11 }
  0x19   : > { %p2106_p7 = pneg %p2096_p6 }
  0x1b   : > { %p1765_p9 = pnand %p1763_p8, %p2106_p7 }
  0x1d   : > { %p1766_p10 = pneg %p1765_p9 }
  0x1f   : > { %p1773_p0 = pnand %p1772_p13, %p1766_p10 }
  0x21   : > { %1776 = shalt.err (!%p1773_p0)
}
  0x22   : > { %s1990_s13 = smov 256   ;;  %s1991_s14 = smov 16  }
  0x23   : > { %s2366_s1 = sld [smem:[#allocation20_spill]]  ;;  %s1788_s21 = scalar_lea.vmem %s2100_s27, 1024 }
  0x24   : > { %p1789_p2 = scmp.ne.s32.totalorder %s2100_s27, %s1788_s21  ;;  %p1796_p9 = scmp.lt.s32.totalorder %s2100_s27, %s2100_s27 }
  0x25   : > { %p1797_p10 = scmp.lt.s32.totalorder %s1788_s21, %s1788_s21 }
  0x26   : > { %p1791_p5 = pnand %p1789_p2, %p2106_p7 }
  0x27   : > { %p1798_p11 = por %p1797_p10, %p1796_p9 }
  0x28   : > { %p1792_p8 = pneg %p1791_p5 }
  0x29   : > { %1590 = dma.hbm_to_vmem [thread:$0]  (!%p2096_p6), %s2366_s1, 4096, %s310_s22, [#allocation6], %s1990_s13, %s1990_s13, %s1991_s14  }
  0x2a   : > { %p1799_p12 = pnand %p1798_p11, %p1792_p8 }
  0x2c   : > { %1802 = shalt.err (!%p1799_p12)
}
  0x2d   : > { %s1992_s26 = smov 64   ;;  %s1993_s28 = smov 4  }
  0x2e   : > { %s2367_s5 = sld [smem:[#allocation22_spill]]  ;;  %s1814_s13 = scalar_lea.vmem %s326_s29, 1024 }
  0x2f   : > { %p1815_p13 = scmp.ne.s32.totalorder %s326_s29, %s1814_s13  ;;  %p1822_p5 = scmp.lt.s32.totalorder %s326_s29, %s326_s29 }
  0x30   : > { %p1823_p8 = scmp.lt.s32.totalorder %s1814_s13, %s1814_s13 }
  0x31   : > { %p1817_p0 = pnand %p1815_p13, %p2106_p7 }
  0x32   : > { %p1824_p9 = por %p1823_p8, %p1822_p5 }
  0x33   : > { %p1818_p2 = pneg %p1817_p0 }
  0x34   : > { %1596 = dma.hbm_to_vmem [thread:$0]  (!%p2096_p6), %s2367_s5, 1024, %s2100_s27, [#allocation9], %s1992_s26, %s1992_s26, %s1993_s28  }
  0x35   : > { %p1825_p10 = pnand %p1824_p9, %p1818_p2 }
  0x37   : > { %1828 = shalt.err (!%p1825_p10)
}
  0x38   : > { %s2368_s3 = sld [smem:[#allocation21_spill]]  ;;  %s1994_s27 = smov [#allocation10]  }
  0x39   : > { %s357_s16 = sshll.u32 %s1994_s27, 4  ;;  %s1995_s21 = smov [#allocation11]   ;;  %s358_s16 = int_to_ptr.vmem [resolvable:$true] %s357_s16 }
  0x3a   : > { %s373_s22 = sshll.u32 %s1995_s21, 4  ;;  %s1840_s12 = scalar_lea.vmem %s358_s16, 1024  ;;  %s374_s22 = int_to_ptr.vmem [resolvable:$true] %s373_s22 }
  0x3b   : > { %p1841_p11 = scmp.ne.s32.totalorder %s358_s16, %s1840_s12  ;;  %p1848_p0 = scmp.lt.s32.totalorder %s358_s16, %s358_s16 }
  0x3c   : > { %p1849_p2 = scmp.lt.s32.totalorder %s1840_s12, %s1840_s12 }
  0x3d   : > { %p1843_p12 = pnand %p1841_p11, %p2106_p7 }
  0x3e   : > { %1593 = dma.hbm_to_vmem [thread:$0]  (!%p2096_p6), %s2368_s3, 1024, %s326_s29, [#allocation6], %s1992_s26, %s1992_s26, %s1993_s28  }
  0x3f   : > { %p1844_p13 = pneg %p1843_p12  ;;  %p1850_p5 = por %p1849_p2, %p1848_p0 }
  0x41   : > { %p1851_p8 = pnand %p1850_p5, %p1844_p13 }
  0x43   : > { %1854 = shalt.err (!%p1851_p8)
}
  0x44   : > { %s2369_s7 = sld [smem:[#allocation23_spill]]  ;;  %s1866_s14 = scalar_lea.vmem %s374_s22, 1024 }
  0x45   : > { %p1867_p9 = scmp.ne.s32.totalorder %s374_s22, %s1866_s14  ;;  %p1874_p12 = scmp.lt.s32.totalorder %s374_s22, %s374_s22 }
  0x46   : > { %p1875_p0 = scmp.lt.s32.totalorder %s1866_s14, %s1866_s14 }
  0x47   : > { %p1869_p10 = pnand %p1867_p9, %p2106_p7 }
  0x48   : > { %p1876_p13 = por %p1875_p0, %p1874_p12 }
  0x49   : > { %p1870_p11 = pneg %p1869_p10 }
  0x4a   : > { %1599 = dma.hbm_to_vmem [thread:$0]  (!%p2096_p6), %s2369_s7, 1024, %s358_s16, [#allocation9], %s1992_s26, %s1992_s26, %s1993_s28  }
  0x4b   : > { %p1877_p2 = pnand %p1876_p13, %p1870_p11 }
  0x4d   : > { %1880 = shalt.err (!%p1877_p2)
}
  0x4e   : > { %s2370_s9 = sld [smem:[#allocation24_spill]]  ;;  %s1356_s25 = sadd.s32 4294967294, %s1985_s20  }
  0x4f   : > { %s2165_s30 = sadd.s32 1, %s1985_s20   ;;  %s37_s16 = sadd.s32 1, %s1981_s19 }
  0x50   : > { %s34_s21 = ssub.s32 %s1985_s20, %s2165_s30  ;;  %p44_p7 = scmp.ne.s32.totalorder %s1981_s19, %s1977_s18 }
  0x51   : > { %p35_p5 = scmp.eq.s32.totalorder %s34_s21, 0  ;;  %p45_p8 = scmp.eq.s32.totalorder %s1985_s20, 0 }
  0x52   : > { %p50_p9 = scmp.ne.s32.totalorder %s1977_s18, %s1973_s17  ;;  %p284_p10 = scmp.eq.s32.totalorder %s2082_s23, 1 }
  0x53   : > { %s2177_s12 = scalar_select %p35_p5, %s1981_s19, %s37_s16  }
  0x54   : > { %1602 = dma.hbm_to_vmem [thread:$0]  (!%p2096_p6), %s2370_s9, 1024, %s374_s22, [#allocation12], %s1992_s26, %s1992_s26, %s1993_s28  }
  0x55   : > { %2371 = sst [smem:[#allocation19_spill]] %s2177_s12  ;;  %p46_p11 = por %p45_p8, %p44_p7 }
  0x56   : > { %p2181_p12 = por %p2354_p1, %p50_p9  ;;  %p2185_p6 = por %p284_p10, %p44_p7 }
  0x57   : > { %p290_p0 = scmp.eq.s32.totalorder %s1356_s25, 1  ;;  %p1616_p13 = scmp.lt.s32.totalorder %s1985_s20, 2 }
  0x58   : > { %s2372_s29 = scalar_select %p2181_p12, 1, 0 }
  0x59   : > { %s2373_s26 = scalar_select %p2185_p6, 1, 0 }
  0x5a   : > { %s390_s28 = sand.u32 1, %s1981_s19   ;;  %p2191_p2 = por %p290_p0, %p50_p9 }
  0x5b   : > { %s1364_s13 = sshll.u32 %s390_s28, 2  ;;  %s1365_s14 = sshll.u32 %s1985_s20, 6 }
  0x5c   : > { %s2374_s22 = scalar_select %p2191_p2, 1, 0 }
  0x5d   : > { %s2199_s16 = scalar_lea.hbm %s2342_s0, %s1365_s14  ;;  %s394_s21 = scalar_lea.vmem [#allocation2], %s1364_s13 }
  0x5e   : > { %s401_s1 = sshll.u32 %s394_s21, 4  ;;  %p2201_p7 = pnand %p1616_p13, %p46_p11  ;;  %s402_s1 = int_to_ptr.vmem [resolvable:$true] %s401_s1 }
  0x5f   : > { %s391_s3 = scalar_lea.sflag [#allocation3], %s390_s28  ;;  %s1881_s5 = scalar_lea.hbm %s2199_s16, 64 }
  0x60   : > { %p1882_p5 = scmp.ne.s32.totalorder %s2199_s16, %s1881_s5  ;;  %p1883_p8 = pneg %p2201_p7 }
  0x61   : > { %s1886_s27 = scalar_lea.hbm %s2342_s0, 128  ;;  %p1887_p11 = scmp.lt.s32.totalorder %s2199_s16, %s2342_s0 }
  0x62   : > { %p1884_p9 = pnand %p1883_p8, %p1882_p5  ;;  %p1888_p0 = scmp.lt.s32.totalorder %s1886_s27, %s1881_s5 }
  0x64   : > { %p1885_p10 = pneg %p1884_p9  ;;  %p1889_p13 = por %p1888_p0, %p1887_p11 }
  0x66   : > { %p1890_p4 = pnand %p1889_p13, %p1885_p10 }
  0x68   : > { %1893 = shalt.err (!%p1890_p4)
}
  0x69   : > { %s1894_s21 = scalar_lea.vmem %s402_s1, 64  ;;  %s1996_s28 = smov [#allocation2]  }
  0x6a   : > { %p1895_p1 = scmp.ne.s32.totalorder %s402_s1, %s1894_s21  ;;  %s1899_s9 = sshll.u32 %s1996_s28, 4  ;;  %s1900_s9 = int_to_ptr.vmem [resolvable:$false] %s1899_s9 }
  0x6b   : > { %s1901_s12 = scalar_lea.vmem %s1900_s9, 128  ;;  %p1902_p5 = scmp.lt.s32.totalorder %s402_s1, %s1900_s9 }
  0x6c   : > { %p1897_p2 = pnand %p1895_p1, %p1883_p8  ;;  %p1903_p9 = scmp.lt.s32.totalorder %s1901_s12, %s1894_s21 }
  0x6e   : > { %p1898_p6 = pneg %p1897_p2  ;;  %p1904_p12 = por %p1903_p9, %p1902_p5 }
  0x70   : > { %p1905_p3 = pnand %p1904_p12, %p1898_p6 }
  0x72   : > { %1908 = shalt.err (!%p1905_p3)
}
  0x73   : > { %1606 = dma.hbm_to_vmem [thread:$0]  (!%p2201_p7), %s2199_s16, 64, %s402_s1, %s391_s3  }
  0x74   : > { %p2376_p10 = scmp.ne.s32.totalorder %s2363_s24, 0 }
  0x75   : > { %s2222_s5 = sand.u32 (!%p2376_p10), 1, %s1977_s18   ;;  %p2377_p1 = scmp.ne.s32.totalorder (!%p2376_p10), %s2372_s29, 0 }
  0x76   : > { %410 = sbr.rel (%p2376_p10) target bundleno = 1219 (0x4c3), region = 64  ;;  %s1367_s7 = sshll.u32 (!%p2376_p10), %s2222_s5, 2 }
  0x77   : > { %s413_s14 = scalar_lea.sflag (!%p2376_p10), [#allocation3], %s2222_s5  ;;  %s2226_s9 = scalar_lea.vmem (!%p2376_p10), [#allocation2], %s1367_s7 }
  0x7b   : > { %1952 = dma.done.wait (%p2377_p1), %s413_s14, 64  }
  0x7c   : > { %1954 = vsyncadd (%p2377_p1), %s413_s14, 4294967232  ;;  %p2378_p3 = scmp.eq.s32.totalorder %s2082_s23, 0 }
  0x7e   : > { %1956 = dma.done.wait (%p2378_p3), [#allocation6], 5120   ;;  %p2379_p4 = pmov %p2378_p3 }
  0x7f   : > { %p2380_p12 = pmov %p2378_p3 }
  0x80   : > { %1958 = vsyncadd (%p2379_p4), [#allocation6], 4294962176 }
  0x81   : > { %1960 = dma.done.wait (%p2380_p12), [#allocation9], 2048   ;;  %p2381_p6 = pmov %p2378_p3 }
  0x82   : > { %p2382_p2 = pmov %p2378_p3 }
  0x83   : > { %1962 = vsyncadd (%p2381_p6), [#allocation9], 4294965248 }
  0x84   : > { %1964 = dma.done.wait (%p2382_p2), [#allocation12], 1024   ;;  %p2383_p7 = pmov %p2382_p2 }
  0x85   : > { %v1997_v0 = vmov 0   ;;  %v1667_v1 = vld [vmem:[#allocation5 + $0xe4] ss:$16 sps:$4 sm:$0xff]   ;;  %v1669_v2 = vld [vmem:[#allocation5 + $0xec] ss:$16 sps:$4 sm:$0xff]   ;;  %v1998_v35 = vmov 0.0  }
  0x86   : > { %1966 = vsyncadd (%p2383_p7), [#allocation12], 4294966272  ;;  %701 = vmatprep.mubr.bf16.mxu0 %v1997_v0  ;;  %742 = vmatprep.mubr.bf16.mxu1 %v1997_v0  ;;  %v1671_v3 = vld [vmem:[#allocation5 + $0xe0] ss:$16 sps:$4 sm:$0xff]   ;;  %v1672_v4 = vld [vmem:[#allocation5 + $0xe8] ss:$16 sps:$4 sm:$0xff]  }
  0x87   : > { %669 = vmatprep.subr.bf16.mxu0 %v1667_v1  ;;  %710 = vmatprep.subr.bf16.mxu1 %v1669_v2  ;;  %v1673_v5 = vld [vmem:[#allocation5 + $0xc4] ss:$16 sps:$4 sm:$0xff]   ;;  %v1675_v6 = vld [vmem:[#allocation5 + $0xcc] ss:$16 sps:$4 sm:$0xff]   ;;  %v1677_v7 = vld [vmem:[#allocation5 + $0xc0] ss:$16 sps:$4 sm:$0xff]  }
  0x88   : > { %670 = vmatpush1.bf16.msra.mxu0 %v1671_v3  ;;  %711 = vmatpush1.bf16.msra.mxu1 %v1672_v4  ;;  %v1678_v8 = vld [vmem:[#allocation5 + $0xc8] ss:$16 sps:$4 sm:$0xff]   ;;  %v1679_v9 = vld [vmem:[#allocation5 + $0xa4] ss:$16 sps:$4 sm:$0xff]   ;;  %v1681_v10 = vld [vmem:[#allocation5 + $0xac] ss:$16 sps:$4 sm:$0xff]  }
  0x89   : > { %671 = vmatprep.subr.bf16.mxu0 %v1673_v5  ;;  %712 = vmatprep.subr.bf16.mxu1 %v1675_v6  ;;  %v1683_v11 = vld [vmem:[#allocation5 + $0xa0] ss:$16 sps:$4 sm:$0xff]   ;;  %v1684_v12 = vld [vmem:[#allocation5 + $0xa8] ss:$16 sps:$4 sm:$0xff]   ;;  %v1685_v13 = vld [vmem:[#allocation5 + $0x84] ss:$16 sps:$4 sm:$0xff]  }
  0x8a   : > { %v1687_v14 = vld [vmem:[#allocation5 + $0x8c] ss:$16 sps:$4 sm:$0xff]   ;;  %v1689_v15 = vld [vmem:[#allocation5 + $0x80] ss:$16 sps:$4 sm:$0xff]   ;;  %v1690_v16 = vld [vmem:[#allocation5 + $0x88] ss:$16 sps:$4 sm:$0xff]  }
  0x8b   : > { %v1691_v17 = vld [vmem:[#allocation5 + $0x64] ss:$16 sps:$4 sm:$0xff]   ;;  %v1693_v18 = vld [vmem:[#allocation5 + $0x6c] ss:$16 sps:$4 sm:$0xff]   ;;  %v1695_v19 = vld [vmem:[#allocation5 + $0x60] ss:$16 sps:$4 sm:$0xff]  }
  0x8c   : > { %672 = vmatpush1.bf16.msra.mxu0 %v1677_v7  ;;  %713 = vmatpush1.bf16.msra.mxu1 %v1678_v8  ;;  %v1696_v20 = vld [vmem:[#allocation5 + $0x68] ss:$16 sps:$4 sm:$0xff]   ;;  %v1697_v21 = vld [vmem:[#allocation5 + $0x44] ss:$16 sps:$4 sm:$0xff]   ;;  %v1699_v22 = vld [vmem:[#allocation5 + $0x4c] ss:$16 sps:$4 sm:$0xff]  }
  0x8d   : > { %673 = vmatprep.subr.bf16.mxu0 %v1679_v9  ;;  %714 = vmatprep.subr.bf16.mxu1 %v1681_v10  ;;  %v1701_v23 = vld [vmem:[#allocation5 + $0x40] ss:$16 sps:$4 sm:$0xff]   ;;  %v1702_v24 = vld [vmem:[#allocation5 + $0x48] ss:$16 sps:$4 sm:$0xff]   ;;  %v1703_v25 = vld [vmem:[#allocation5 + $0x24] ss:$16 sps:$4 sm:$0xff]  }
  0x8e   : > { %v1705_v26 = vld [vmem:[#allocation5 + $0x2c] ss:$16 sps:$4 sm:$0xff]   ;;  %v1707_v27 = vld [vmem:[#allocation5 + $0x20] ss:$16 sps:$4 sm:$0xff]   ;;  %v1708_v28 = vld [vmem:[#allocation5 + $0x28] ss:$16 sps:$4 sm:$0xff]  }
  0x8f   : > { %v1709_v29 = vld [vmem:[#allocation5 + $0x4] ss:$16 sps:$4 sm:$0xff]   ;;  %v1711_v30 = vld [vmem:[#allocation5 + $0xc] ss:$16 sps:$4 sm:$0xff]   ;;  %v1713_v31 = vld [vmem:[#allocation5] ss:$16 sps:$4 sm:$0xff]  }
  0x90   : > { %674 = vmatpush1.bf16.msra.mxu0 %v1683_v11  ;;  %715 = vmatpush1.bf16.msra.mxu1 %v1684_v12  ;;  %v1714_v32 = vld [vmem:[#allocation5 + $0x8] ss:$16 sps:$4 sm:$0xff]   ;;  %v1716_v36 = vld [vmem:[#allocation7 + $0x30] sm:$0xff]   ;;  %v1718_v38 = vld [vmem:[#allocation7 + $0x20] sm:$0xff]   ;;  %vm1999_vm0 = vmmov 0   ;;  %s1373_s21 = sshll.u32 %s2222_s5, 3 }
  0x91   : > { %675 = vmatprep.subr.bf16.mxu0 %v1685_v13  ;;  %716 = vmatprep.subr.bf16.mxu1 %v1687_v14  ;;  %v476_v33 = vld [vmem:[%s2226_s9] sm:$0xf]  ;;  %v1717_v37 = vld [vmem:[#allocation7 + $0x28] sm:$0xff]   ;;  %v1720_v40 = vld [vmem:[#allocation7 + $0x10] sm:$0xff]   ;;  %s1444_s28 = sshll.u32 %s2082_s23, 7  ;;  %s474_s7 = scalar_lea.vmem [#allocation13], %s1373_s21 }
  0x92   : > { %v1715_v34 = vld [vmem:[#allocation7 + $0x38] sm:$0xff]   ;;  %v1721_v41 = vld [vmem:[#allocation7 + $0x8] sm:$0xff]   ;;  %v1722_v42 = vld [vmem:[#allocation7] sm:$0xff]   ;;  %s1238_s14 = sshll.u32 %s474_s7, 4  ;;  %s2305_s3 = scalar_lea.hbm %s2353_s11, %s1444_s28  ;;  %s1239_s14 = int_to_ptr.vmem [resolvable:$true] %s1238_s14 }
  0x93   : > { %v1719_v39 = vld [vmem:[#allocation7 + $0x18] sm:$0xff]   ;;  %v1724_v44 = vld [vmem:[#allocation8 + $0x30] sm:$0xff]   ;;  %v1725_v45 = vld [vmem:[#allocation8 + $0x28] sm:$0xff]   ;;  %s1225_s24 = scalar_lea.sflag [#allocation4], %s2222_s5  ;;  %s1909_s12 = scalar_lea.vmem %s1239_s14, 128 }
  0x94   : > { %676 = vmatpush1.bf16.msra.mxu0 %v1689_v15  ;;  %717 = vmatpush1.bf16.msra.mxu1 %v1690_v16  ;;  %v1723_v43 = vld [vmem:[#allocation8 + $0x38] sm:$0xff]   ;;  %v1726_v46 = vld [vmem:[#allocation8 + $0x20] sm:$0xff]   ;;  %v1728_v48 = vld [vmem:[#allocation8 + $0x10] sm:$0xff]   ;;  %p1910_p8 = scmp.ne.s32.totalorder %s1239_s14, %s1909_s12  ;;  %p2384_p11 = scmp.ne.s32.totalorder %s2373_s26, 0 }
  0x95   : > { %677 = vmatprep.subr.bf16.mxu0 %v1691_v17  ;;  %718 = vmatprep.subr.bf16.mxu1 %v1693_v18  ;;  %v1727_v47 = vld [vmem:[#allocation8 + $0x18] sm:$0xff]   ;;  %v1729_v1 = vld [vmem:[#allocation8 + $0x8] sm:$0xff]   ;;  %v1730_v2 = vld [vmem:[#allocation8] sm:$0xff]   ;;  %s2000_s29 = smov [#allocation13]  }
  0x96   : > { %v1406_v55 = vld [vmem:[%s2344_s2] ss:$0 sm:$0xff]  ;;  %v1732_v4 = vld [vmem:[#allocation10 + $0x30] sm:$0xff]   ;;  %v1733_v5 = vld [vmem:[#allocation10 + $0x28] sm:$0xff]   ;;  %p1911_p0 = pnand %p1910_p8, %p2384_p11  ;;  %s1913_s16 = sshll.u32 %s2000_s29, 4  ;;  %s1914_s16 = int_to_ptr.vmem [resolvable:$false] %s1913_s16 }
  0x97   : > { %v1731_v3 = vld [vmem:[#allocation10 + $0x38] sm:$0xff]   ;;  %v1734_v6 = vld [vmem:[#allocation10 + $0x20] sm:$0xff]   ;;  %v1736_v8 = vld [vmem:[#allocation10 + $0x10] sm:$0xff]   ;;  %s1915_s23 = scalar_lea.vmem %s1914_s16, 256  ;;  %p1916_p5 = scmp.lt.s32.totalorder %s1239_s14, %s1914_s16 }
  0x98   : > { %678 = vmatpush1.bf16.msra.mxu0 %v1695_v19  ;;  %719 = vmatpush1.bf16.msra.mxu1 %v1696_v20  ;;  %v1735_v7 = vld [vmem:[#allocation10 + $0x18] sm:$0xff]   ;;  %v1737_v18 = vld [vmem:[#allocation10 + $0x8] sm:$0xff]   ;;  %v1738_v19 = vld [vmem:[#allocation10] sm:$0xff]   ;;  %p1912_p13 = pneg %p1911_p0  ;;  %p1917_p9 = scmp.lt.s32.totalorder %s1915_s23, %s1909_s12 }
  0x99   : > { %679 = vmatprep.subr.bf16.mxu0 %v1697_v21  ;;  %720 = vmatprep.subr.bf16.mxu1 %v1699_v22  ;;  %v1407_v9 = vld [vmem:[%s2346_s4] ss:$0 sm:$0xff]  ;;  %v1740_v21 = vld [vmem:[#allocation11 + $0x30] sm:$0xff]   ;;  %v1741_v22 = vld [vmem:[#allocation11 + $0x28] sm:$0xff]  }
  0x9a   : > { %v1739_v20 = vld [vmem:[#allocation11 + $0x38] sm:$0xff]   ;;  %p1918_p10 = por %p1917_p9, %p1916_p5 }
  0x9c   : > { %680 = vmatpush1.bf16.msra.mxu0 %v1701_v23  ;;  %721 = vmatpush1.bf16.msra.mxu1 %v1702_v24  ;;  %v1742_v23 = vld [vmem:[#allocation11 + $0x20] sm:$0xff]   ;;  %v1743_v24 = vld [vmem:[#allocation11 + $0x18] sm:$0xff]   ;;  %p1919_p1 = pnand %p1918_p10, %p1912_p13 }
  0x9d   : > { %681 = vmatprep.subr.bf16.mxu0 %v1703_v25  ;;  %722 = vmatprep.subr.bf16.mxu1 %v1705_v26  ;;  %v1744_v25 = vld [vmem:[#allocation11 + $0x10] sm:$0xff]   ;;  %v1416_v26 = vld [vmem:[%s2348_s6] ss:$0 sm:$0xff] }
  0xa0   : > { %682 = vmatpush1.bf16.msra.mxu0 %v1707_v27  ;;  %723 = vmatpush1.bf16.msra.mxu1 %v1708_v28 }
  0xa1   : > { %683 = vmatprep.subr.bf16.mxu0 %v1709_v29  ;;  %724 = vmatprep.subr.bf16.mxu1 %v1711_v30 }
  0xa4   : > { %684 = vmatpush1.bf16.msra.mxu0 %v1713_v31  ;;  %725 = vmatpush1.bf16.msra.mxu1 %v1714_v32 }
  0xa5   : > { %1483 = vmatprep.subr.bf16.mxu0 %v1998_v35  ;;  %1503 = vmatprep.subr.bf16.mxu1 %v1998_v35 }
  0xa7   : > { %702 = vmatmul.mubr.bf16.vlgmr.msra.gmra.mxu0 %v476_v33  ;;  %743 = vmatmul.mubr.bf16.vlgmr.msra.gmra.mxu1 %v476_v33 }
  0xa8   : > { %1484 = vmatpush3.bf16.msra.mxu0 %v1715_v34  ;;  %1499 = vmatprep.mubr.msk.bf16.mxu0 %vm1999_vm0, %v1998_v35 }
  0xa9   : > { %1485 = vmatprep.subr.bf16.mxu0 %v1998_v35  ;;  %1519 = vmatprep.mubr.msk.bf16.mxu1 %vm1999_vm0, %v1998_v35 }
  0xaa   : > { %1504 = vmatpush3.bf16.msra.mxu1 %v1723_v43 }
  0xab   : > { %1505 = vmatprep.subr.bf16.mxu1 %v1998_v35 }
  0xac   : > { %1486 = vmatpush3.bf16.msra.mxu0 %v1716_v36  ;;  %v1745_v36 = vld [vmem:[#allocation11 + $0x8] sm:$0xff]  }
  0xad   : > { %1487 = vmatprep.subr.bf16.mxu0 %v1998_v35 }
  0xae   : > { %1506 = vmatpush3.bf16.msra.mxu1 %v1724_v44 }
  0xaf   : > { %1507 = vmatprep.subr.bf16.mxu1 %v1998_v35 }
  0xb0   : > { %1488 = vmatpush3.bf16.msra.mxu0 %v1717_v37  ;;  %v1746_v37 = vld [vmem:[#allocation11] sm:$0xff]  }
  0xb1   : > { %1489 = vmatprep.subr.bf16.mxu0 %v1998_v35 }
  0xb2   : > { %1508 = vmatpush3.bf16.msra.mxu1 %v1725_v45 }
  0xb3   : > { %1509 = vmatprep.subr.bf16.mxu1 %v1998_v35 }
  0xb4   : > { %1490 = vmatpush3.bf16.msra.mxu0 %v1718_v38  ;;  %v1425_v38 = vld [vmem:[%s2350_s8] ss:$0 sm:$0xff] }
  0xb5   : > { %1491 = vmatprep.subr.bf16.mxu0 %v1998_v35 }
  0xb6   : > { %1510 = vmatpush3.bf16.msra.mxu1 %v1726_v46 }
  0xb7   : > { %1511 = vmatprep.subr.bf16.mxu1 %v1998_v35 }
  0xb8   : > { %1492 = vmatpush3.bf16.msra.mxu0 %v1719_v39 }
  0xb9   : > { %1493 = vmatprep.subr.bf16.mxu0 %v1998_v35 }
  0xba   : > { %1512 = vmatpush3.bf16.msra.mxu1 %v1727_v47 }
  0xbb   : > { %1513 = vmatprep.subr.bf16.mxu1 %v1998_v35 }
  0xbc   : > { %1494 = vmatpush3.bf16.msra.mxu0 %v1720_v40 }
  0xbd   : > { %1495 = vmatprep.subr.bf16.mxu0 %v1998_v35 }
  0xbe   : > { %1514 = vmatpush3.bf16.msra.mxu1 %v1728_v48 }
  0xbf   : > { %1515 = vmatprep.subr.bf16.mxu1 %v1998_v35 }
  0xc0   : > { %1496 = vmatpush3.bf16.msra.mxu0 %v1721_v41 }
  0xc1   : > { %1497 = vmatprep.subr.bf16.mxu0 %v1998_v35 }
  0xc2   : > { %1516 = vmatpush3.bf16.msra.mxu1 %v1729_v1 }
  0xc3   : > { %1517 = vmatprep.subr.bf16.mxu1 %v1998_v35 }
  0xc4   : > { %1498 = vmatpush3.bf16.msra.mxu0 %v1722_v42 }
  0xc5   : > { %1523 = vmatprep.subr.bf16.mxu0 %v1998_v35 }
  0xc6   : > { %1518 = vmatpush3.bf16.msra.mxu1 %v1730_v2 }
  0xc7   : > { %1543 = vmatprep.subr.bf16.mxu1 %v1998_v35 }
 0x167   : > { %v703_v49 = vpop.f32.mrf.mxu0  ;;  %v744_v50 = vpop.f32.mrf.mxu1 }
 0x169   : > { %v705_v51 = vpop.f32.mrf.mxu0  ;;  %v746_v52 = vpop.f32.mrf.mxu1 }
 0x16a   : > { %v751_v53 = vmax.f32 %v703_v49, %v705_v51  ;;  %v752_v54 = vmax.f32 %v744_v50, %v746_v52 }
 0x16b   : > { %v707_v56 = vpop.f32.mrf.mxu0  ;;  %v748_v57 = vpop.f32.mrf.mxu1 }
 0x16c   : > { %v753_v58 = vmax.f32 %v751_v53, %v752_v54 }
 0x16d   : > { %v708_v59 = vpop.f32.mrf.mxu0  ;;  %v749_v60 = vpop.f32.mrf.mxu1 }
 0x16e   : > { %v761_v61 = vadd.f32 %v1406_v55, %v753_v58 }
 0x170   : > { %v762_v62 = vmul.f32 0.2, %v761_v61 }
 0x172   : > { %v763_v63 = vmax.f32 %v761_v61, %v762_v62 }
 0x174   : > { %v764_v0 = vpack.c.bf16 %v763_v63, %v763_v63 }
 0x176   : > { %1500 = vmatmul.mubr.bf16.vlgmr.msra.gmra.mxu0 %v764_v0 }
 0x177   : > { %1539 = vmatprep.mubr.msk.bf16.mxu0 %vm1999_vm0, %v1998_v35  ;;  %1524 = vmatpush3.bf16.msra.mxu0 %v1731_v3 }
 0x178   : > { %1525 = vmatprep.subr.bf16.mxu0 %v1998_v35 }
 0x17b   : > { %1526 = vmatpush3.bf16.msra.mxu0 %v1732_v4 }
 0x17c   : > { %1527 = vmatprep.subr.bf16.mxu0 %v1998_v35 }
 0x17f   : > { %1528 = vmatpush3.bf16.msra.mxu0 %v1733_v5 }
 0x180   : > { %1529 = vmatprep.subr.bf16.mxu0 %v1998_v35 }
 0x183   : > { %1530 = vmatpush3.bf16.msra.mxu0 %v1734_v6 }
 0x184   : > { %1531 = vmatprep.subr.bf16.mxu0 %v1998_v35 }
 0x187   : > { %1532 = vmatpush3.bf16.msra.mxu0 %v1735_v7 }
 0x188   : > { %1533 = vmatprep.subr.bf16.mxu0 %v1998_v35 }
 0x18b   : > { %1534 = vmatpush3.bf16.msra.mxu0 %v1736_v8 }
 0x18c   : > { %1535 = vmatprep.subr.bf16.mxu0 %v1998_v35 }
 0x18f   : > { %1536 = vmatpush3.bf16.msra.mxu0 %v1737_v18 }
 0x190   : > { %1537 = vmatprep.subr.bf16.mxu0 %v1998_v35 }
 0x193   : > { %1538 = vmatpush3.bf16.msra.mxu0 %v1738_v19 }
 0x236   : > { %v870_v10 = vpop.f32.mrf.mxu0 }
 0x237   : > { %v871_v11 = vadd.f32 %v1407_v9, %v870_v10 }
 0x238   : > { %v1501_v12 = vpop.f32.mrf.mxu0 }
 0x239   : > { %v876_v13 = vmul.f32 0.2, %v871_v11 }
 0x23a   : > { %v873_v14 = vpop.f32.mrf.mxu0 }
 0x23b   : > { %v877_v15 = vmax.f32 %v871_v11, %v876_v13 }
 0x23c   : > { %v1502_v16 = vpop.f32.mrf.mxu0 }
 0x23d   : > { %v878_v17 = vpack.c.bf16 %v877_v15, %v877_v15 }
 0x23f   : > { %1520 = vmatmul.mubr.bf16.vlgmr.msra.gmra.mxu1 %v878_v17 }
 0x240   : > { %1559 = vmatprep.mubr.msk.bf16.mxu1 %vm1999_vm0, %v1998_v35  ;;  %1544 = vmatpush3.bf16.msra.mxu1 %v1739_v20 }
 0x241   : > { %1545 = vmatprep.subr.bf16.mxu1 %v1998_v35 }
 0x244   : > { %1546 = vmatpush3.bf16.msra.mxu1 %v1740_v21 }
 0x245   : > { %1547 = vmatprep.subr.bf16.mxu1 %v1998_v35 }
 0x248   : > { %1548 = vmatpush3.bf16.msra.mxu1 %v1741_v22 }
 0x249   : > { %1549 = vmatprep.subr.bf16.mxu1 %v1998_v35 }
 0x24c   : > { %1550 = vmatpush3.bf16.msra.mxu1 %v1742_v23 }
 0x24d   : > { %1551 = vmatprep.subr.bf16.mxu1 %v1998_v35 }
 0x250   : > { %1552 = vmatpush3.bf16.msra.mxu1 %v1743_v24 }
 0x251   : > { %1553 = vmatprep.subr.bf16.mxu1 %v1998_v35 }
 0x254   : > { %1554 = vmatpush3.bf16.msra.mxu1 %v1744_v25 }
 0x255   : > { %1555 = vmatprep.subr.bf16.mxu1 %v1998_v35 }
 0x258   : > { %1556 = vmatpush3.bf16.msra.mxu1 %v1745_v36 }
 0x259   : > { %1557 = vmatprep.subr.bf16.mxu1 %v1998_v35  ;;  %v1434_v35 = vld [vmem:[%s2352_s10] ss:$0 sm:$0xff] }
 0x25c   : > { %1558 = vmatpush3.bf16.msra.mxu1 %v1746_v37 }
 0x2ff   : > { %v984_v27 = vpop.f32.mrf.mxu1 }
 0x300   : > { %v985_v28 = vadd.f32 %v1416_v26, %v984_v27 }
 0x301   : > { %v1521_v29 = vpop.f32.mrf.mxu1 }
 0x302   : > { %v990_v30 = vmul.f32 0.2, %v985_v28 }
 0x303   : > { %v987_v31 = vpop.f32.mrf.mxu1 }
 0x304   : > { %v991_v32 = vmax.f32 %v985_v28, %v990_v30 }
 0x305   : > { %v1522_v33 = vpop.f32.mrf.mxu1 }
 0x306   : > { %v992_v34 = vpack.c.bf16 %v991_v32, %v991_v32 }
 0x308   : > { %1540 = vmatmul.mubr.bf16.vlgmr.msra.gmra.mxu0 %v992_v34 }
 0x3c8   : > { %v1098_v39 = vpop.f32.mrf.mxu0 }
 0x3c9   : > { %v1099_v40 = vadd.f32 %v1425_v38, %v1098_v39 }
 0x3ca   : > { %v1541_v41 = vpop.f32.mrf.mxu0 }
 0x3cb   : > { %v1104_v42 = vmul.f32 0.2, %v1099_v40 }
 0x3cc   : > { %v1101_v43 = vpop.f32.mrf.mxu0 }
 0x3cd   : > { %v1105_v44 = vmax.f32 %v1099_v40, %v1104_v42 }
 0x3ce   : > { %v1542_v45 = vpop.f32.mrf.mxu0 }
 0x3cf   : > { %v1106_v46 = vpack.c.bf16 %v1105_v44, %v1105_v44 }
 0x3d1   : > { %1560 = vmatmul.mubr.bf16.vlgmr.msra.gmra.mxu1 %v1106_v46 }
 0x491   : > { %v1212_v47 = vpop.f32.mrf.mxu1 }
 0x492   : > { %v1213_v48 = vadd.f32 %v1434_v35, %v1212_v47 }
 0x493   : > { %v1561_v49 = vpop.f32.mrf.mxu1 }
 0x494   : > { %v1218_v50 = vsub.f32 0.0, %v1213_v48 }
 0x495   : > { %v1215_v51 = vpop.f32.mrf.mxu1 }
 0x496   : > { %v1219_v52 = vmul.f32 1.442695, %v1218_v50 }
 0x497   : > { %v1562_v53 = vpop.f32.mrf.mxu1 }
 0x498   : > { %1747 = vpow2.f32 %v1219_v52 }
 0x4a5   : > { %v1748_v54 = vpop.eup %1747 }
 0x4a6   : > { %v1221_v55 = vadd.f32 1.0, %v1748_v54 }
 0x4a8   : > { %1749 = vrcp.f32 %v1221_v55 }
 0x4b5   : > { %v1750_v56 = vpop.eup %1749 }
 0x4b6   : > { %1223 = vst [vmem:[%s474_s7] sm:$0xff] %v1750_v56 }
 0x4b7   : > { %1922 = shalt.err (!%p1919_p1)
}
 0x4b8   : > { %s1923_s25 = scalar_lea.hbm %s2305_s3, 128  ;;  %s1927_s27 = scalar_lea.hbm %s2353_s11, 256 }
 0x4b9   : > { %p1924_p3 = scmp.ne.s32.totalorder %s2305_s3, %s1923_s25  ;;  %p1928_p6 = scmp.lt.s32.totalorder %s2305_s3, %s2353_s11 }
 0x4ba   : > { %p1929_p2 = scmp.lt.s32.totalorder %s1927_s27, %s1923_s25 }
 0x4bb   : > { %p1925_p4 = pnand %p1924_p3, %p2384_p11 }
 0x4bc   : > { %p1930_p7 = por %p1929_p2, %p1928_p6 }
 0x4bd   : > { %p1926_p12 = pneg %p1925_p4 }
 0x4bf   : > { %p1931_p8 = pnand %p1930_p7, %p1926_p12 }
 0x4c1   : > { %1934 = shalt.err (!%p1931_p8)
}
 0x4c2   : > { %1585 = dma.vmem_to_hbm [thread:$0]  (%p2384_p11), %s1239_s14, 128, %s2305_s3, %s1225_s24  }
 0x4c3 PF: > { %s1250_s28 = sand.u32 1, %s1973_s17   ;;  %p2385_p0 = scmp.ne.s32.totalorder %s2374_s22, 0 }
 0x4c4   : > { %p2386_p13 = scmp.ge.s32.totalorder %s1985_s20, 2  ;;  %s1251_s7 = scalar_lea.sflag [#allocation4], %s1250_s28 }
 0x4c6   : > { %p1608_p5 = pnand %p2386_p13, %p2385_p0 }
 0x4c8   : > { %p1609_p9 = pneg %p1608_p5 }
 0x4ca   : > { %1968 = dma.done.wait (%p1609_p9), %s1251_s7, 128  }
 0x4cb   : > { %1970 = vsyncadd (%p1609_p9), %s1251_s7, 4294967168  ;;  %s2387_s9 = sld [smem:[#allocation19_spill]]  ;;  %p27_p10 = scmp.ge.s32.totalorder %s2165_s30, 4  }
 0x4cc   : > { %s2388_s17 = smov %s1977_s18  ;;  %s2389_s18 = smov %s1981_s19 }
 0x4cd   : > { %s2391_s20 = smov %s2165_s30  ;;  %29 = sbr.rel (!%p27_p10) target bundleno = 14 (0xe), region = 129 }
 0x4d1   : > { %s2390_s19 = smov %s2387_s9 }
 0x4d2   :  { %1256 = vsyncpa [#allocation3], 1 }
 0x4d3   :  { %1258 = vsyncpa [#allocation3 + $0x1], 1 }
 0x4d4   :  { %1259 = vsyncpa [#allocation6], 1 }
 0x4d5   :  { %1260 = vsyncpa [#allocation9], 1 }
 0x4d6   :  { %1261 = vsyncpa [#allocation12], 1 }
 0x4d7   :  { %1262 = vsyncpa [#allocation4], 1 }
 0x4d8   :  { %1264 = vsyncpa [#allocation4 + $0x1], 1 }

</bundles_post_ra>
